<compile_context>
chip_gen: v7x
topology: tpu7x:2x2x1
jax: 0.10.0
libtpu: 0.0.40
codegen_flags: <defaults>
</compile_context>

<pallas_src>
import functools

import jax
import jax.numpy as jnp
from jax import lax
from jax.experimental import pallas as pl
from jax.experimental.pallas import tpu as pltpu

_LANES = 128
_CHUNK_ROWS = 512                      # rows per in-register sub-chunk
_TARGET_BLOCK_BYTES = 4 * 1024 * 1024  # ~4 MiB per input block (x2 inputs x2 bufs)


def _round_up(x, m):
    return ((x + m - 1) // m) * m


def _cdiv(a, b):
    return -(-a // b)


def _num_tensorcores():
    """Best-effort TensorCores-per-device count (perf-only; correctness holds
    for any value)."""
    try:
        kind = jax.devices()[0].device_kind.lower()
    except Exception:
        return 1
    if "lite" in kind or "v5e" in kind or "v6e" in kind:
        return 1                       # v5e / v6e: single TensorCore
    if "v7" in kind or "v4" in kind or "v5p" in kind:
        return 2                       # dual-TC / megacore chips
    return 1


def _focal_loss_kernel(pred_ref, gt_ref, acc_ref, *, block_rows, chunk_rows,
                       valid_rows, nblocks, blocks_per_split, need_mask):
    s = pl.program_id(0)   # core-split axis ("parallel")
    i = pl.program_id(1)   # streaming reduction axis ("arbitrary")

    # Zero this split's resident accumulator block on its first step.
    @pl.when(i == 0)
    def _():
        acc_ref[...] = jnp.zeros_like(acc_ref)

    nchunks = block_rows // chunk_rows

    def accumulate(rem):
        """Accumulate this block. rem=None -> every row is valid; otherwise
        rows with index >= rem (within this block) are padding/garbage."""
        masked = rem is not None
        zero8 = jnp.zeros((8, _LANES), jnp.float32)

        def body(c, carry):
            loss_acc, cnt_acc = carry
            r0 = pl.multiple_of(c * chunk_rows, chunk_rows)
            p = pred_ref[pl.ds(r0, chunk_rows), :].astype(jnp.float32)
            g = gt_ref[pl.ds(r0, chunk_rows), :].astype(jnp.float32)

            if masked:
                # Only the edge (tail / clamped) block runs this path.
                row = lax.broadcasted_iota(jnp.int32, (chunk_rows, _LANES), 0)
                valid = row < (rem - c * chunk_rows)   # scalar bound per chunk
                p = jnp.where(valid, p, 0.5)   # keeps both logs finite
                g = jnp.where(valid, g, 2.0)   # neither positive nor negative

            one_m_p = 1.0 - p
            one_m_g = 1.0 - g
            is_pos = g == 1.0
            is_neg = g < 1.0

            pos_loss = jnp.log(p) * (one_m_p * one_m_p)
            w2 = one_m_g * one_m_g
            neg_loss = jnp.log(one_m_p) * (p * p) * (w2 * w2)

            loss = jnp.where(is_pos, pos_loss,
                             jnp.where(is_neg, neg_loss, 0.0))
            cnt = jnp.where(is_pos, 1.0, 0.0)

            # Fold the (chunk_rows, 128) tile to one (8, 128) vreg of per-lane
            # partial sums (plain VPU adds); cross-lane reduction is done once
            # in the wrapper.
            fold = lambda x: x.reshape(chunk_rows // 8, 8, _LANES).sum(axis=0)
            return loss_acc + fold(loss), cnt_acc + fold(cnt)

        loss8, cnt8 = lax.fori_loop(0, nchunks, body, (zero8, zero8))
        acc_ref[0, 0] += loss8
        acc_ref[0, 1] += cnt8

    if need_mask:
        logical = s * blocks_per_split + i
        is_edge = logical >= (nblocks - 1)

        @pl.when(jnp.logical_not(is_edge))
        def _():
            accumulate(None)

        @pl.when(is_edge)
        def _():
            # Remaining valid rows in this block (<= 0 for fully-redundant
            # clamped blocks, which then contribute exactly zero).
            accumulate(valid_rows - logical * block_rows)
    else:
        accumulate(None)


def _loss_and_count(pred, gt):
    """Plain-jnp per-element loss + positive count (used for ragged tails)."""
    pred = pred.astype(jnp.float32)
    gt = gt.astype(jnp.float32)
    is_pos = gt == 1.0
    is_neg = gt < 1.0
    pos_loss = jnp.log(pred) * jnp.square(1.0 - pred)
    w2 = jnp.square(1.0 - gt)
    neg_loss = jnp.log(1.0 - pred) * jnp.square(pred) * (w2 * w2)
    loss = jnp.where(is_pos, pos_loss, jnp.where(is_neg, neg_loss, 0.0))
    return loss.sum(), jnp.where(is_pos, 1.0, 0.0).sum()


def focal_loss(pred, gt):
    """Pallas implementation of CornerNet focal loss. pred/gt: same shape."""
    assert pred.shape == gt.shape, (pred.shape, gt.shape)

    # Keep supported narrow dtypes as-is in HBM (halves streaming bytes);
    # each input is cast to f32 per-chunk inside the kernel.
    def _norm(x):
        if x.dtype in (jnp.float32, jnp.bfloat16, jnp.float16):
            return x
        return x.astype(jnp.float32)

    pred = _norm(pred)
    gt = _norm(gt)

    n = pred.size
    itemsizes = (pred.dtype.itemsize, gt.dtype.itemsize)
    sub = 8 if min(itemsizes) >= 4 else 16
    unit = sub * _LANES

    pred_f = pred.reshape(-1)
    gt_f = gt.reshape(-1)

    n_main = (n // unit) * unit
    tail_loss = jnp.float32(0.0)
    tail_pos = jnp.float32(0.0)
    if n_main != n:
        # Ragged remainder (< sublane*128 elements): cheap in plain jnp; keeps
        # the kernel path free of padding copies for the aligned prefix.
        tail_loss, tail_pos = _loss_and_count(pred_f[n_main:], gt_f[n_main:])

    if n_main == 0:
        loss_sum, num_pos = tail_loss, tail_pos
    else:
        if n_main != n:
            pred_f = pred_f[:n_main]
            gt_f = gt_f[:n_main]

        rows = n_main // _LANES                       # multiple of `sub` (>= 8)
        pred2d = pred_f.reshape(rows, _LANES)         # free reshape, no copy
        gt2d = gt_f.reshape(rows, _LANES)

        max_itemsize = max(itemsizes)
        max_block_rows = _TARGET_BLOCK_BYTES // (_LANES * max_itemsize)

        if rows <= _CHUNK_ROWS:
            block_rows = rows                         # single full-dim block
            chunk_rows = rows
        else:
            block_rows = min(max_block_rows, _round_up(rows, _CHUNK_ROWS))
            chunk_rows = _CHUNK_ROWS                  # divides block_rows

        nblocks = _cdiv(rows, block_rows)
        nsplits = 2 if (_num_tensorcores() >= 2 and nblocks >= 2) else 1
        bps = _cdiv(nblocks, nsplits)                 # blocks per split
        need_mask = (nsplits * bps * block_rows) != rows

        def in_idx(s, i):
            # Clamp so redundant tail blocks re-read the last real block
            # (their contribution is masked out in-kernel).
            return (jnp.minimum(s * bps + i, nblocks - 1), 0)

        kernel = functools.partial(
            _focal_loss_kernel,
            block_rows=block_rows,
            chunk_rows=chunk_rows,
            valid_rows=rows,
            nblocks=nblocks,
            blocks_per_split=bps,
            need_mask=need_mask,
        )

        acc = pl.pallas_call(
            kernel,
            out_shape=jax.ShapeDtypeStruct((nsplits, 2, 8, _LANES), jnp.float32),
            grid_spec=pltpu.PrefetchScalarGridSpec(
                num_scalar_prefetch=0,
                grid=(nsplits, bps),
                in_specs=[
                    pl.BlockSpec((block_rows, _LANES), in_idx),
                    pl.BlockSpec((block_rows, _LANES), in_idx),
                ],
                out_specs=pl.BlockSpec((1, 2, 8, _LANES),
                                       lambda s, i: (s, 0, 0, 0)),
            ),
            compiler_params=pltpu.CompilerParams(
                dimension_semantics=("parallel", "arbitrary"),
                vmem_limit_bytes=32 * 1024 * 1024,
            ),
        )(pred2d, gt2d)

        # Tiny cross-lane / cross-split reduction.
        sums = jnp.sum(acc, axis=(0, 2, 3))           # (2,)
        loss_sum = sums[0] + tail_loss
        num_pos = sums[1] + tail_pos

    # num_pos == 0  =>  all positive terms in loss_sum are identically zero, so
    # -loss_sum / max(num_pos, 1) reproduces both branches of the reference.
    return -loss_sum / jnp.maximum(num_pos, 1.0)


def _focal_loss_ref(pred, gt):
    """Literal translation of the PyTorch module (for testing)."""
    pred = pred.astype(jnp.float32)
    gt = gt.astype(jnp.float32)
    pos_inds = (gt == 1.0).astype(jnp.float32)
    neg_inds = (gt < 1.0).astype(jnp.float32)
    neg_weights = (1.0 - gt) ** 4
    pos_loss = jnp.log(pred) * (1.0 - pred) ** 2 * pos_inds
    neg_loss = jnp.log(1.0 - pred) * pred ** 2 * neg_weights * neg_inds
    num_pos = pos_inds.sum()
    pos_loss = pos_loss.sum()
    neg_loss = neg_loss.sum()
    return jnp.where(num_pos == 0.0, -neg_loss,
                     -(pos_loss + neg_loss) / jnp.maximum(num_pos, 1.0))


if __name__ == "__main__":
    key = jax.random.PRNGKey(0)
    kp, kg, km = jax.random.split(key, 3)

    B, C, H, W = 2, 4, 16, 16  # NCHW, matching the PyTorch module's convention

    # pred: probabilities in (0, 1); gt: gaussian-like heatmap in [0, 1] with
    # some exact 1.0 peaks (positive locations).
    pred = jax.random.uniform(kp, (B, C, H, W), jnp.float32, 1e-4, 1.0 - 1e-4)
    gt = jax.random.uniform(kg, (B, C, H, W), jnp.float32, 0.0, 0.999)
    peak_mask = jax.random.uniform(km, (B, C, H, W)) < 0.02
    gt = jnp.where(peak_mask, 1.0, gt)

    out = focal_loss(pred, gt)
    out = jax.block_until_ready(out)

    ref = _focal_loss_ref(pred, gt)
    assert jnp.allclose(out, ref, rtol=1e-5, atol=1e-5), (out, ref)

    print("KERNEL_OK")
</pallas_src>

<mosaic_0001>
module attributes {stable_mosaic.version = 11 : i64} {
  func.func @_focal_loss_kernel(%arg0: i32, %arg1: i32, %arg2: memref<16x128xf32, #tpu.memory_space<vmem>>, %arg3: memref<16x128xf32, #tpu.memory_space<vmem>>, %arg4: memref<1x2x8x128xf32, #tpu.memory_space<vmem>>) attributes {dimension_semantics = [#tpu.dimension_semantics<parallel>, #tpu.dimension_semantics<arbitrary>], iteration_bounds = array<i64: 1, 1>, scalar_prefetch = 0 : i64, scratch_operands = 0 : i64, tpu.core_type = #tpu.core_type<tc>, window_params = [{transform_indices = @transform_0, window_bounds = array<i64: 16, 128>}, {transform_indices = @transform_1, window_bounds = array<i64: 16, 128>}, {transform_indices = @transform_2, window_bounds = array<i64: 1, 2, 8, 128>}]} {
    %c0_i32 = arith.constant 0 : i32
    %0 = arith.cmpi eq, %arg1, %c0_i32 : i32
    %1 = arith.extui %0 : i1 to i32
    %c0_i32_0 = arith.constant 0 : i32
    %2 = arith.cmpi ne, %1, %c0_i32_0 : i32
    scf.if %2 {
      %cst_27 = arith.constant 0.000000e+00 : f32
      %51 = vector.broadcast %cst_27 : f32 to vector<1x2x8x128xf32>
      %c0_28 = arith.constant 0 : index
      %c0_29 = arith.constant 0 : index
      %c0_30 = arith.constant 0 : index
      %c0_31 = arith.constant 0 : index
      %52 = vector.load %arg4[%c0_28, %c0_29, %c0_30, %c0_31] : memref<1x2x8x128xf32, #tpu.memory_space<vmem>>, vector<1x2x8x128xf32>
      tpu.vector_store %arg4[%c0_28, %c0_29, %c0_30, %c0_31], %51 {strides = array<i32>} : memref<1x2x8x128xf32, #tpu.memory_space<vmem>>, vector<1x2x8x128xf32>,
    } else {
    }
    %cst = arith.constant 0.000000e+00 : f32
    %3 = vector.broadcast %cst : f32 to vector<8x128xf32>
    %c0_i32_1 = arith.constant 0 : i32
    %c16_i32 = arith.constant 16 : i32
    %4 = arith.muli %c0_i32_1, %c16_i32 : i32
    %5 = tpu.assume_multiple %4, 16 : i32
    %6 = arith.index_cast %5 : i32 to index
    %c0 = arith.constant 0 : index
    %7 = vector.load %arg2[%6, %c0] : memref<16x128xf32, #tpu.memory_space<vmem>>, vector<16x128xf32>
    %8 = arith.index_cast %5 : i32 to index
    %c0_2 = arith.constant 0 : index
    %9 = vector.load %arg3[%8, %c0_2] : memref<16x128xf32, #tpu.memory_space<vmem>>, vector<16x128xf32>
    %cst_3 = arith.constant 1.000000e+00 : f32
    %10 = vector.broadcast %cst_3 : f32 to vector<16x128xf32>
    %11 = arith.subf %10, %7 : vector<16x128xf32>
    %cst_4 = arith.constant 1.000000e+00 : f32
    %12 = vector.broadcast %cst_4 : f32 to vector<16x128xf32>
    %13 = arith.subf %12, %9 : vector<16x128xf32>
    %cst_5 = arith.constant 1.000000e+00 : f32
    %14 = vector.broadcast %cst_5 : f32 to vector<16x128xf32>
    %15 = arith.cmpf oeq, %9, %14 : vector<16x128xf32>
    %cst_6 = arith.constant 1.000000e+00 : f32
    %16 = vector.broadcast %cst_6 : f32 to vector<16x128xf32>
    %17 = arith.cmpf olt, %9, %16 : vector<16x128xf32>
    %18 = math.log %7 : vector<16x128xf32>
    %19 = arith.mulf %11, %11 : vector<16x128xf32>
    %20 = arith.mulf %18, %19 : vector<16x128xf32>
    %21 = arith.mulf %13, %13 : vector<16x128xf32>
    %22 = math.log %11 : vector<16x128xf32>
    %23 = arith.mulf %7, %7 : vector<16x128xf32>
    %24 = arith.mulf %22, %23 : vector<16x128xf32>
    %25 = arith.mulf %21, %21 : vector<16x128xf32>
    %26 = arith.mulf %24, %25 : vector<16x128xf32>
    %cst_7 = arith.constant 0.000000e+00 : f32
    %27 = vector.broadcast %cst_7 : f32 to vector<16x128xf32>
    %28 = arith.select %17, %26, %27 : vector<16x128xi1>, vector<16x128xf32>
    %29 = arith.select %15, %20, %28 : vector<16x128xi1>, vector<16x128xf32>
    %cst_8 = arith.constant 1.000000e+00 : f32
    %cst_9 = arith.constant 0.000000e+00 : f32
    %30 = vector.broadcast %cst_8 : f32 to vector<16x128xf32>
    %31 = vector.broadcast %cst_9 : f32 to vector<16x128xf32>
    %32 = arith.select %15, %30, %31 : vector<16x128xi1>, vector<16x128xf32>
    %33 = vector.shape_cast %29 : vector<16x128xf32> to vector<2x8x128xf32>
    %cst_10 = arith.constant dense<0.000000e+00> : vector<8x128xf32>
    %34 = vector.multi_reduction <add>, %33, %cst_10 [0] : vector<2x8x128xf32> to vector<8x128xf32>
    %35 = arith.addf %3, %34 : vector<8x128xf32>
    %36 = vector.shape_cast %32 : vector<16x128xf32> to vector<2x8x128xf32>
    %cst_11 = arith.constant dense<0.000000e+00> : vector<8x128xf32>
    %37 = vector.multi_reduction <add>, %36, %cst_11 [0] : vector<2x8x128xf32> to vector<8x128xf32>
    %38 = arith.addf %3, %37 : vector<8x128xf32>
    %c1_i32 = arith.constant 1 : i32
    %c0_12 = arith.constant 0 : index
    %c0_13 = arith.constant 0 : index
    %c0_14 = arith.constant 0 : index
    %c0_15 = arith.constant 0 : index
    %39 = vector.load %arg4[%c0_12, %c0_13, %c0_14, %c0_15] : memref<1x2x8x128xf32, #tpu.memory_space<vmem>>, vector<1x1x8x128xf32>
    %40 = vector.shape_cast %39 : vector<1x1x8x128xf32> to vector<8x128xf32>
    %41 = arith.addf %40, %35 : vector<8x128xf32>
    %c0_16 = arith.constant 0 : index
    %c0_17 = arith.constant 0 : index
    %c0_18 = arith.constant 0 : index
    %c0_19 = arith.constant 0 : index
    %42 = vector.load %arg4[%c0_16, %c0_17, %c0_18, %c0_19] : memref<1x2x8x128xf32, #tpu.memory_space<vmem>>, vector<1x1x8x128xf32>
    %43 = vector.shape_cast %42 : vector<1x1x8x128xf32> to vector<8x128xf32>
    %44 = vector.shape_cast %41 : vector<8x128xf32> to vector<1x1x8x128xf32>
    tpu.vector_store %arg4[%c0_16, %c0_17, %c0_18, %c0_19], %44 {strides = array<i32>} : memref<1x2x8x128xf32, #tpu.memory_space<vmem>>, vector<1x1x8x128xf32>,
    %c0_20 = arith.constant 0 : index
    %c1 = arith.constant 1 : index
    %c0_21 = arith.constant 0 : index
    %c0_22 = arith.constant 0 : index
    %45 = vector.load %arg4[%c0_20, %c1, %c0_21, %c0_22] : memref<1x2x8x128xf32, #tpu.memory_space<vmem>>, vector<1x1x8x128xf32>
    %46 = vector.shape_cast %45 : vector<1x1x8x128xf32> to vector<8x128xf32>
    %47 = arith.addf %46, %38 : vector<8x128xf32>
    %c0_23 = arith.constant 0 : index
    %c1_24 = arith.constant 1 : index
    %c0_25 = arith.constant 0 : index
    %c0_26 = arith.constant 0 : index
    %48 = vector.load %arg4[%c0_23, %c1_24, %c0_25, %c0_26] : memref<1x2x8x128xf32, #tpu.memory_space<vmem>>, vector<1x1x8x128xf32>
    %49 = vector.shape_cast %48 : vector<1x1x8x128xf32> to vector<8x128xf32>
    %50 = vector.shape_cast %47 : vector<8x128xf32> to vector<1x1x8x128xf32>
    tpu.vector_store %arg4[%c0_23, %c1_24, %c0_25, %c0_26], %50 {strides = array<i32>} : memref<1x2x8x128xf32, #tpu.memory_space<vmem>>, vector<1x1x8x128xf32>,
    return
  }
  func.func @transform_0(%arg0: i32, %arg1: i32) -> (i32, i32) {
    %c1_i32 = arith.constant 1 : i32
    %0 = arith.muli %arg0, %c1_i32 : i32
    %1 = arith.addi %0, %arg1 : i32
    %c0_i32 = arith.constant 0 : i32
    %2 = arith.minsi %1, %c0_i32 : i32
    %c0_i32_0 = arith.constant 0 : i32
    %c0_i32_1 = arith.constant 0 : i32
    return %2, %c0_i32_0 : i32, i32
  }
  func.func @transform_1(%arg0: i32, %arg1: i32) -> (i32, i32) {
    %c1_i32 = arith.constant 1 : i32
    %0 = arith.muli %arg0, %c1_i32 : i32
    %1 = arith.addi %0, %arg1 : i32
    %c0_i32 = arith.constant 0 : i32
    %2 = arith.minsi %1, %c0_i32 : i32
    %c0_i32_0 = arith.constant 0 : i32
    %c0_i32_1 = arith.constant 0 : i32
    return %2, %c0_i32_0 : i32, i32
  }
  func.func @transform_2(%arg0: i32, %arg1: i32) -> (i32, i32, i32, i32) {
    %c0_i32 = arith.constant 0 : i32
    %c0_i32_0 = arith.constant 0 : i32
    %c0_i32_1 = arith.constant 0 : i32
    %c0_i32_2 = arith.constant 0 : i32
    return %arg0, %c0_i32, %c0_i32_0, %c0_i32_1 : i32, i32, i32, i32
  }
}

</mosaic_0001>

<bundles_post_ra>
// kernel: tpu_custom_call.1
= control target key start
LH: loop header
LB: loop body
LE: loop exit
PB: predicated region body
PF: predicated region fallthrough
CT: control target
= control target key end

     0   :  { %7 = vsyncpa [#allocation3], 0  ;;  %s295_s0 = inlined_call_operand.hbm [shape: f32[16,128], index: 0, kind: input, shape index: {}]   ;;  %s296_s1 = inlined_call_operand.hbm [shape: f32[16,128], index: 1, kind: input, shape index: {}]   ;;  %s297_s2 = inlined_call_operand.hbm [shape: f32[1,2,8,128], index: 2, kind: output, shape index: {}]  }
   0x1   :  { %8 = vsyncpa [#allocation6], 0 }
   0x2   :  { %9 = vsyncpa [#allocation4], 0  ;;  %s225_s9 = smov [#allocation2]   ;;  %s153_s13 = scalar_lea.hbm %s295_s0, 256 }
   0x3   :  { %s21_s10 = sshll.u32 %s225_s9, 4  ;;  %p154_p0 = scmp.ne.s32.totalorder %s295_s0, %s153_s13  ;;  %s22_s10 = int_to_ptr.vmem [resolvable:$true] %s21_s10 }
   0x4   :  { %p157_p1 = scmp.lt.u32.totalorder %s153_s13, %s295_s0 }
   0x6   :  { %p159_p2 = pnand %p157_p1, %p154_p0 }
   0x8   :  { %162 = shalt.err (!%p159_p2)
}
   0x9   :  { %s163_s18 = scalar_lea.vmem %s22_s10, 256  ;;  %p168_p4 = scmp.lt.s32.totalorder %s22_s10, %s22_s10 }
   0xa   :  { %p164_p3 = scmp.ne.s32.totalorder %s22_s10, %s163_s18  ;;  %p169_p5 = scmp.lt.s32.totalorder %s163_s18, %s163_s18 }
   0xc   :  { %p170_p6 = por %p169_p5, %p168_p4 }
   0xe   :  { %p171_p7 = pnand %p170_p6, %p164_p3 }
  0x10   :  { %174 = shalt.err (!%p171_p7)
}
  0x11   :  { %s226_s19 = smov 128   ;;  %s227_s20 = smov 8  }
  0x12   :  { %27 = dma.hbm_to_vmem [thread:$0]  %s295_s0, 256, %s22_s10, [#allocation3], %s226_s19, %s226_s19, %s227_s20  }
  0x13   :  { %s228_s23 = smov [#allocation5]   ;;  %s175_s27 = scalar_lea.hbm %s296_s1, 256 }
  0x14   :  { %s39_s24 = sshll.u32 %s228_s23, 4  ;;  %p176_p8 = scmp.ne.s32.totalorder %s296_s1, %s175_s27  ;;  %s40_s24 = int_to_ptr.vmem [resolvable:$true] %s39_s24 }
  0x15   :  { %p179_p9 = scmp.lt.u32.totalorder %s175_s27, %s296_s1 }
  0x17   :  { %p181_p10 = pnand %p179_p9, %p176_p8 }
  0x19   :  { %184 = shalt.err (!%p181_p10)
}
  0x1a   :  { %s185_s4 = scalar_lea.vmem %s40_s24, 256  ;;  %p190_p12 = scmp.lt.s32.totalorder %s40_s24, %s40_s24 }
  0x1b   :  { %p186_p11 = scmp.ne.s32.totalorder %s40_s24, %s185_s4  ;;  %p191_p13 = scmp.lt.s32.totalorder %s185_s4, %s185_s4 }
  0x1d   :  { %p192_p0 = por %p191_p13, %p190_p12 }
  0x1f   :  { %p193_p1 = pnand %p192_p0, %p186_p11 }
  0x21   :  { %196 = shalt.err (!%p193_p1)
}
  0x22   :  { %45 = dma.hbm_to_vmem [thread:$0]  %s296_s1, 256, %s40_s24, [#allocation6], %s226_s19, %s226_s19, %s227_s20  }
  0x23   :  { %219 = dma.done.wait [#allocation3], 256  }
  0x24   :  { %220 = vsyncadd [#allocation3], 4294967040 }
  0x25   :  { %221 = dma.done.wait [#allocation6], 256  }
  0x26   :  { %222 = vsyncadd [#allocation6], 4294967040  ;;  %v66_v0 = vld [vmem:[#allocation2] sm:$0xff]  ;;  %v67_v1 = vld [vmem:[#allocation2 + $0x8] sm:$0xff]  ;;  %v229_v6 = vmov 0.0   ;;  %s230_s1 = smov [#allocation7]  }
  0x27   :  { %v68_v2 = vld [vmem:[#allocation5] sm:$0xff]  ;;  %v69_v3 = vld [vmem:[#allocation5 + $0x8] sm:$0xff]  ;;  %v70_v4 = vsub.f32 1.0, %v66_v0  ;;  %v71_v5 = vsub.f32 1.0, %v67_v1  ;;  %145 = vlog2.f32 %v66_v0  ;;  %v92_v16 = vmul.f32 %v66_v0, %v66_v0  ;;  %s122_s6 = sshll.u32 %s230_s1, 4  ;;  %s123_s6 = int_to_ptr.vmem [resolvable:$true] %s122_s6 }
  0x28   :  { %vm74_vm0 = vcmp.eq.f32.partialorder %v68_v2, 1.0  ;;  %vm75_vm1 = vcmp.eq.f32.partialorder %v69_v3, 1.0  ;;  %147 = vlog2.f32 %v67_v1  ;;  %v72_v10 = vsub.f32 1.0, %v68_v2  ;;  %s197_s7 = scalar_lea.vmem %s123_s6, 256  ;;  %p202_p3 = scmp.lt.s32.totalorder %s123_s6, %s123_s6 }
  0x29   :  { %149 = vlog2.f32 %v70_v4  ;;  %v104_v7 = vsel %vm74_vm0, 1.0, %v229_v6  ;;  %v105_v8 = vsel %vm75_vm1, 1.0, %v229_v6  ;;  %v73_v11 = vsub.f32 1.0, %v69_v3  ;;  %p198_p2 = scmp.ne.s32.totalorder %s123_s6, %s197_s7  ;;  %p203_p4 = scmp.lt.s32.totalorder %s197_s7, %s197_s7 }
  0x2a   :  { %151 = vlog2.f32 %v71_v5  ;;  %v108_v9 = vadd.f32 %v105_v8, %v104_v7  ;;  %v86_v12 = vmul.f32 %v72_v10, %v72_v10  ;;  %v82_v19 = vmul.f32 %v70_v4, %v70_v4 }
  0x2b   :  { %v87_v14 = vmul.f32 %v73_v11, %v73_v11  ;;  %v93_v20 = vmul.f32 %v67_v1, %v67_v1  ;;  %v83_v23 = vmul.f32 %v71_v5, %v71_v5  ;;  %vm76_vm2 = vcmp.lt.f32.partialorder %v68_v2, 1.0  ;;  %p204_p5 = por %p203_p4, %p202_p3 }
  0x2c   :  { %116 = vst [vmem:[#allocation7 + $0x8] sm:$0xff] %v108_v9  ;;  %v96_v25 = vmul.f32 %v86_v12, %v86_v12  ;;  %vm77_vm3 = vcmp.lt.f32.partialorder %v69_v3, 1.0 }
  0x2d   :  { %v97_v27 = vmul.f32 %v87_v14, %v87_v14  ;;  %p205_p6 = pnand %p204_p5, %p198_p2 }
  0x31   :  { %v146_v13 = vpop.eup %145 }
  0x32   :  { %v148_v15 = vpop.eup %147  ;;  %v79_v18 = vmul.f32 0.6931472, %v146_v13 }
  0x33   :  { %v150_v17 = vpop.eup %149  ;;  %v81_v22 = vmul.f32 0.6931472, %v148_v15 }
  0x34   :  { %v152_v21 = vpop.eup %151  ;;  %v89_v24 = vmul.f32 0.6931472, %v150_v17  ;;  %v84_v29 = vmul.f32 %v82_v19, %v79_v18 }
  0x35   :  { %v91_v26 = vmul.f32 0.6931472, %v152_v21  ;;  %v85_v31 = vmul.f32 %v83_v23, %v81_v22 }
  0x36   :  { %v94_v28 = vmul.f32 %v92_v16, %v89_v24 }
  0x37   :  { %v95_v30 = vmul.f32 %v93_v20, %v91_v26 }
  0x38   :  { %v98_v32 = vmul.f32 %v96_v25, %v94_v28 }
  0x39   :  { %v99_v33 = vmul.f32 %v97_v27, %v95_v30 }
  0x3a   :  { %v100_v34 = vsel %vm76_vm2, %v98_v32, 0.0 }
  0x3b   :  { %v101_v35 = vsel %vm77_vm3, %v99_v33, 0.0  ;;  %v102_v36 = vsel %vm74_vm0, %v84_v29, %v100_v34 }
  0x3c   :  { %v103_v37 = vsel %vm75_vm1, %v85_v31, %v101_v35 }
  0x3d   :  { %v106_v38 = vadd.f32 %v103_v37, %v102_v36 }
  0x3f   :  { %112 = vst [vmem:[#allocation7] sm:$0xff] %v106_v38 }
  0x40   :  { %208 = shalt.err (!%p205_p6)
}
  0x41   :  { %s209_s10 = scalar_lea.hbm %s297_s2, 256 }
  0x42   :  { %p210_p7 = scmp.ne.s32.totalorder %s297_s2, %s209_s10  ;;  %p213_p8 = scmp.lt.u32.totalorder %s209_s10, %s297_s2 }
  0x44   :  { %p215_p9 = pnand %p213_p8, %p210_p7 }
  0x46   :  { %218 = shalt.err (!%p215_p9)
}
  0x47   :  { %128 = dma.vmem_to_hbm [thread:$0]  %s123_s6, 256, %s297_s2, [#allocation4], %s226_s19, %s226_s19, %s227_s20  }
  0x48   :  { %223 = dma.done.wait [#allocation4], 256  }
  0x49   :  { %224 = vsyncadd [#allocation4], 4294967040 }
  0x4a   :  { %132 = vsyncpa [#allocation3], 1 }
  0x4b   :  { %133 = vsyncpa [#allocation6], 1 }
  0x4c   :  { %134 = vsyncpa [#allocation4], 1 }

</bundles_post_ra>
